<compile_context>
chip_gen: v6e
topology: v6e:2x2x1
jax: 0.10.0
libtpu: 0.0.40
codegen_flags: <defaults>
</compile_context>

<pallas_src>
import jax
import jax.numpy as jnp
from jax.experimental import pallas as pl
from jax.experimental.pallas import tpu as pltpu

FEATURE_DIM = 256
HIDDEN2 = FEATURE_DIM // 2      # 128
NUM_CLASSES = 11
CLASS_PAD = 128                 # lane-dense padded logits width
LN_EPS = 1e-5
MAX_BATCH_TILE = 1024           # << 16 MiB scoped VMEM even at this size


def _round_up(n, m):
    return ((n + m - 1) // m) * m


def _tile_plan(batch, max_tile=MAX_BATCH_TILE):
    """Pick (batch_tile, padded_batch).

    Large tiles amortize per-grid-step overhead (single-TC v5e/v6e); if more
    than one step is needed, keep the step count even so v7x's two TensorCores
    split the "parallel" batch axis without imbalance.
    """
    steps = pl.cdiv(batch, max_tile)
    if steps > 1 and steps % 2 == 1:
        steps += 1
    tile = _round_up(pl.cdiv(batch, steps), 16)   # 16: bf16 sublane packing
    return tile, steps * tile


def _layernorm_relu(h, gamma, beta, ones_over_d):
    """LayerNorm(+affine) + ReLU with MXU-based lane reductions.

    `ones_over_d` is a (D, D) bf16 matrix filled with 1/D, so h @ ones_over_d
    yields the row-mean already broadcast across all lanes (no XLU reduce or
    lane broadcast).  Variance is computed from centered values (numerically
    stable two-pass form).  Returns bf16 (input to the next matmul).
    """
    mu = jnp.dot(h.astype(jnp.bfloat16), ones_over_d,
                 preferred_element_type=jnp.float32)          # (bt, D), lane-bcast
    c = h - mu
    var = jnp.dot((c * c).astype(jnp.bfloat16), ones_over_d,
                  preferred_element_type=jnp.float32)         # (bt, D), lane-bcast
    y = c * jax.lax.rsqrt(var + LN_EPS) * gamma + beta
    return jnp.maximum(y, 0.0).astype(jnp.bfloat16)


def mlp_kernel(x_ref, w1_ref, w2_ref, w3_ref, ones1_ref, ones2_ref, vec_ref,
               o_ref):
    vec = vec_ref[...]                   # (8, 256) f32 packed small vectors
    b1, g1, be1 = vec[0:1, :], vec[1:2, :], vec[2:3, :]
    b2 = vec[3:4, :HIDDEN2]
    g2 = vec[4:5, :HIDDEN2]
    be2 = vec[5:6, :HIDDEN2]
    b3 = vec[6:7, :CLASS_PAD]

    # In-kernel bf16 cast of the f32 input (saves a separate HBM pass over x).
    x = x_ref[...].astype(jnp.bfloat16)          # (bt, 256)

    # Block 1: Linear(256 -> 256) + LayerNorm + ReLU   (Dropout = identity, eval)
    h = jnp.dot(x, w1_ref[...], preferred_element_type=jnp.float32) + b1
    h = _layernorm_relu(h, g1, be1, ones1_ref[...])

    # Block 2: Linear(256 -> 128) + LayerNorm + ReLU   (Dropout = identity, eval)
    h = jnp.dot(h, w2_ref[...], preferred_element_type=jnp.float32) + b2
    h = _layernorm_relu(h, g2, be2, ones2_ref[...])

    # Block 3: Linear(128 -> 11) logits, lane-dense into 128 padded cols, bf16 out.
    logits = jnp.dot(h, w3_ref[...], preferred_element_type=jnp.float32) + b3
    o_ref[...] = logits.astype(o_ref.dtype)


def pack_params(params):
    """One-time parameter packing (call once, reuse across forward calls).

    Casts weights to bf16, pads w3/b3 to 128 classes, packs the seven 1-row
    bias/LN vectors into one (8, 256) f32 block (single DMA), and builds the
    1/D reduction matrices used for the MXU-based LayerNorm statistics.
    """
    (w1, b1, g1, be1, w2, b2, g2, be2, w3, b3) = params
    D = FEATURE_DIM

    w1_p = jnp.asarray(w1, jnp.bfloat16)                              # (256, 256)
    w2_p = jnp.asarray(w2, jnp.bfloat16)                              # (256, 128)
    w3_p = jnp.pad(jnp.asarray(w3, jnp.float32),
                   ((0, 0), (0, CLASS_PAD - w3.shape[1]))
                   ).astype(jnp.bfloat16)                             # (128, 128)

    ones1 = jnp.full((D, D), 1.0 / D, jnp.bfloat16)                   # exact in bf16
    ones2 = jnp.full((HIDDEN2, HIDDEN2), 1.0 / HIDDEN2, jnp.bfloat16)

    def row(v):
        v = jnp.asarray(v, jnp.float32).reshape(1, -1)
        return jnp.pad(v, ((0, 0), (0, D - v.shape[1])))              # (1, 256)

    vec = jnp.concatenate(
        [row(b1), row(g1), row(be1), row(b2), row(g2), row(be2), row(b3),
         jnp.zeros((1, D), jnp.float32)],
        axis=0)                                                       # (8, 256)
    return w1_p, w2_p, w3_p, ones1, ones2, vec


def activity_classifier_forward(x, packed):
    """x: (B, FEATURE_DIM) float32, packed = pack_params(params).

    Returns logits (B, NUM_CLASSES) float32.
    """
    B, D = x.shape
    assert D == FEATURE_DIM
    w1_p, w2_p, w3_p, ones1, ones2, vec = packed

    batch_tile, B_pad = _tile_plan(B)
    if B_pad != B:
        x = jnp.pad(x, ((0, B_pad - B), (0, 0)))

    grid = (B_pad // batch_tile,)

    out = pl.pallas_call(
        mlp_kernel,
        out_shape=jax.ShapeDtypeStruct((B_pad, CLASS_PAD), jnp.bfloat16),
        grid_spec=pltpu.PrefetchScalarGridSpec(
            num_scalar_prefetch=0,
            grid=grid,
            in_specs=[
                pl.BlockSpec((batch_tile, D), lambda i: (i, 0)),        # x tile (f32)
                pl.BlockSpec((D, D), lambda i: (0, 0)),                 # w1
                pl.BlockSpec((D, HIDDEN2), lambda i: (0, 0)),           # w2
                pl.BlockSpec((HIDDEN2, CLASS_PAD), lambda i: (0, 0)),   # w3 (padded)
                pl.BlockSpec((D, D), lambda i: (0, 0)),                 # ones/256
                pl.BlockSpec((HIDDEN2, HIDDEN2), lambda i: (0, 0)),     # ones/128
                pl.BlockSpec((8, D), lambda i: (0, 0)),                 # packed vectors
            ],
            out_specs=pl.BlockSpec((batch_tile, CLASS_PAD), lambda i: (i, 0)),
        ),
        compiler_params=pltpu.CompilerParams(
            dimension_semantics=("parallel",)),
    )(x, w1_p, w2_p, w3_p, ones1, ones2, vec)

    # Drop batch padding / lane padding; restore the caller's f32 contract.
    return out[:B, :NUM_CLASSES].astype(jnp.float32)


def init_params(key):
    """Deterministic synthetic parameters matching the module's shapes (f32)."""
    D, H2, C = FEATURE_DIM, HIDDEN2, NUM_CLASSES
    ks = jax.random.split(key, 3)

    def lin(k, fan_in, fan_out):
        bound = 1.0 / jnp.sqrt(fan_in)
        kw, kb = jax.random.split(k)
        w = jax.random.uniform(kw, (fan_in, fan_out), jnp.float32, -bound, bound)
        b = jax.random.uniform(kb, (1, fan_out), jnp.float32, -bound, bound)
        return w, b

    w1, b1 = lin(ks[0], D, D)
    w2, b2 = lin(ks[1], D, H2)
    w3, b3 = lin(ks[2], H2, C)
    # LayerNorm affine params: gamma=1, beta=0 (PyTorch default init).
    g1, be1 = jnp.ones((1, D), jnp.float32), jnp.zeros((1, D), jnp.float32)
    g2, be2 = jnp.ones((1, H2), jnp.float32), jnp.zeros((1, H2), jnp.float32)
    return (w1, b1, g1, be1, w2, b2, g2, be2, w3, b3)


def _matched_reference(x, params):
    """Pure-JAX replica of the kernel's exact arithmetic (bf16 matmuls,
    MXU-ones LayerNorm reductions, bf16 output round).  Verifies Pallas
    plumbing (tiling / packing / padding) with a tight tolerance."""
    (w1, b1, g1, be1, w2, b2, g2, be2, w3, b3) = params
    bf = jnp.bfloat16

    def ln_relu(h, g, be):
        d = h.shape[-1]
        ones = jnp.full((d, d), 1.0 / d, bf)
        mu = jnp.dot(h.astype(bf), ones, preferred_element_type=jnp.float32)
        c = h - mu
        var = jnp.dot((c * c).astype(bf), ones, preferred_element_type=jnp.float32)
        y = c * jax.lax.rsqrt(var + LN_EPS) * g + be
        return jnp.maximum(y, 0.0).astype(bf)

    h = jnp.dot(x.astype(bf), w1.astype(bf),
                preferred_element_type=jnp.float32) + b1
    h = ln_relu(h, g1, be1)
    h = jnp.dot(h, w2.astype(bf), preferred_element_type=jnp.float32) + b2
    h = ln_relu(h, g2, be2)
    out = jnp.dot(h, w3.astype(bf), preferred_element_type=jnp.float32) + b3
    return out.astype(bf).astype(jnp.float32)


def _f32_reference(x, params):
    """Full-f32 reference of the module's eval-mode forward (ground truth)."""
    (w1, b1, g1, be1, w2, b2, g2, be2, w3, b3) = params

    def ln(h, g, be):
        mu = jnp.mean(h, axis=-1, keepdims=True)
        var = jnp.mean((h - mu) ** 2, axis=-1, keepdims=True)
        return (h - mu) * jax.lax.rsqrt(var + LN_EPS) * g + be

    h = jnp.maximum(ln(x @ w1 + b1, g1, be1), 0.0)
    h = jnp.maximum(ln(h @ w2 + b2, g2, be2), 0.0)
    return h @ w3 + b3


if __name__ == "__main__":
    key = jax.random.PRNGKey(0)
    k_x, k_p = jax.random.split(key)

    B = 8
    x = jax.random.normal(k_x, (B, FEATURE_DIM), jnp.float32)
    params = init_params(k_p)

    # TODO(synk): dropout (train-mode / MC-dropout) is omitted; this implements
    # the eval-mode forward, which is the module's default deterministic path.

    # Pack weights ONCE (hoisted out of the per-call path), reuse across calls.
    packed = pack_params(params)
    fwd = jax.jit(activity_classifier_forward)

    out = jax.block_until_ready(fwd(x, packed))
    assert out.shape == (B, NUM_CLASSES)

    # Tight check against a reference that replicates the kernel's arithmetic.
    ref_matched = _matched_reference(x, params)
    assert jnp.allclose(out, ref_matched, atol=1e-2, rtol=1e-2), \
        "mismatch vs matched-precision reference"

    # Loose sanity check against the full-f32 reference (bf16 rounding budget).
    ref_f32 = _f32_reference(x, params)
    assert jnp.allclose(out, ref_f32, atol=1e-1, rtol=1e-1), \
        "mismatch vs f32 reference"

    print("KERNEL_OK")
</pallas_src>

<mosaic_0001>
module attributes {stable_mosaic.version = 11 : i64} {
  func.func @mlp_kernel(%arg0: i32, %arg1: memref<16x256xf32, #tpu.memory_space<vmem>>, %arg2: memref<256x256xbf16, #tpu.memory_space<vmem>>, %arg3: memref<256x128xbf16, #tpu.memory_space<vmem>>, %arg4: memref<128x128xbf16, #tpu.memory_space<vmem>>, %arg5: memref<256x256xbf16, #tpu.memory_space<vmem>>, %arg6: memref<128x128xbf16, #tpu.memory_space<vmem>>, %arg7: memref<8x256xf32, #tpu.memory_space<vmem>>, %arg8: memref<16x128xbf16, #tpu.memory_space<vmem>>) attributes {dimension_semantics = [#tpu.dimension_semantics<parallel>], iteration_bounds = array<i64: 1>, scalar_prefetch = 0 : i64, scratch_operands = 0 : i64, tpu.core_type = #tpu.core_type<tc>, window_params = [{transform_indices = @transform_0, window_bounds = array<i64: 16, 256>}, {pipeline_mode = #tpu.pipeline_mode<synchronous>, transform_indices = @transform_1, window_bounds = array<i64: 256, 256>}, {pipeline_mode = #tpu.pipeline_mode<synchronous>, transform_indices = @transform_2, window_bounds = array<i64: 256, 128>}, {pipeline_mode = #tpu.pipeline_mode<synchronous>, transform_indices = @transform_3, window_bounds = array<i64: 128, 128>}, {pipeline_mode = #tpu.pipeline_mode<synchronous>, transform_indices = @transform_4, window_bounds = array<i64: 256, 256>}, {pipeline_mode = #tpu.pipeline_mode<synchronous>, transform_indices = @transform_5, window_bounds = array<i64: 128, 128>}, {pipeline_mode = #tpu.pipeline_mode<synchronous>, transform_indices = @transform_6, window_bounds = array<i64: 8, 256>}, {transform_indices = @transform_7, window_bounds = array<i64: 16, 128>}]} {
    %c0 = arith.constant 0 : index
    %c0_0 = arith.constant 0 : index
    %0 = vector.load %arg7[%c0, %c0_0] : memref<8x256xf32, #tpu.memory_space<vmem>>, vector<8x256xf32>
    %1 = vector.extract_strided_slice %0 {offsets = [0, 0], sizes = [1, 256], strides = [1, 1]} : vector<8x256xf32> to vector<1x256xf32>
    %2 = vector.extract_strided_slice %0 {offsets = [1, 0], sizes = [1, 256], strides = [1, 1]} : vector<8x256xf32> to vector<1x256xf32>
    %3 = vector.extract_strided_slice %0 {offsets = [2, 0], sizes = [1, 256], strides = [1, 1]} : vector<8x256xf32> to vector<1x256xf32>
    %4 = vector.extract_strided_slice %0 {offsets = [3, 0], sizes = [1, 128], strides = [1, 1]} : vector<8x256xf32> to vector<1x128xf32>
    %5 = vector.extract_strided_slice %0 {offsets = [4, 0], sizes = [1, 128], strides = [1, 1]} : vector<8x256xf32> to vector<1x128xf32>
    %6 = vector.extract_strided_slice %0 {offsets = [5, 0], sizes = [1, 128], strides = [1, 1]} : vector<8x256xf32> to vector<1x128xf32>
    %7 = vector.extract_strided_slice %0 {offsets = [6, 0], sizes = [1, 128], strides = [1, 1]} : vector<8x256xf32> to vector<1x128xf32>
    %c0_1 = arith.constant 0 : index
    %c0_2 = arith.constant 0 : index
    %8 = vector.load %arg1[%c0_1, %c0_2] : memref<16x256xf32, #tpu.memory_space<vmem>>, vector<16x256xf32>
    %9 = arith.truncf %8 : vector<16x256xf32> to vector<16x256xbf16>
    %c0_3 = arith.constant 0 : index
    %c0_4 = arith.constant 0 : index
    %10 = vector.load %arg2[%c0_3, %c0_4] : memref<256x256xbf16, #tpu.memory_space<vmem>>, vector<256x256xbf16>
    %cst = arith.constant dense<0.000000e+00> : vector<16x256xf32>
    %11 = tpu.matmul %9, %10, %cst {dimension_numbers = #tpu.dot_dimension_numbers<[1], [0], [0], [1], [0, 0, 1, 1], [], []>} : vector<16x256xbf16>, vector<256x256xbf16>, vector<16x256xf32> -> vector<16x256xf32>
    %12 = vector.broadcast %1 : vector<1x256xf32> to vector<16x256xf32>
    %13 = arith.addf %11, %12 : vector<16x256xf32>
    %c0_5 = arith.constant 0 : index
    %c0_6 = arith.constant 0 : index
    %14 = vector.load %arg5[%c0_5, %c0_6] : memref<256x256xbf16, #tpu.memory_space<vmem>>, vector<256x256xbf16>
    %15 = arith.truncf %13 : vector<16x256xf32> to vector<16x256xbf16>
    %cst_7 = arith.constant dense<0.000000e+00> : vector<16x256xf32>
    %16 = tpu.matmul %15, %14, %cst_7 {dimension_numbers = #tpu.dot_dimension_numbers<[1], [0], [0], [1], [0, 0, 1, 1], [], []>} : vector<16x256xbf16>, vector<256x256xbf16>, vector<16x256xf32> -> vector<16x256xf32>
    %17 = arith.subf %13, %16 : vector<16x256xf32>
    %18 = arith.mulf %17, %17 : vector<16x256xf32>
    %19 = arith.truncf %18 : vector<16x256xf32> to vector<16x256xbf16>
    %cst_8 = arith.constant dense<0.000000e+00> : vector<16x256xf32>
    %20 = tpu.matmul %19, %14, %cst_8 {dimension_numbers = #tpu.dot_dimension_numbers<[1], [0], [0], [1], [0, 0, 1, 1], [], []>} : vector<16x256xbf16>, vector<256x256xbf16>, vector<16x256xf32> -> vector<16x256xf32>
    %cst_9 = arith.constant 9.99999974E-6 : f32
    %21 = vector.broadcast %cst_9 : f32 to vector<16x256xf32>
    %22 = arith.addf %20, %21 : vector<16x256xf32>
    %23 = math.rsqrt %22 : vector<16x256xf32>
    %24 = arith.mulf %17, %23 : vector<16x256xf32>
    %25 = vector.broadcast %2 : vector<1x256xf32> to vector<16x256xf32>
    %26 = arith.mulf %24, %25 : vector<16x256xf32>
    %27 = vector.broadcast %3 : vector<1x256xf32> to vector<16x256xf32>
    %28 = arith.addf %26, %27 : vector<16x256xf32>
    %cst_10 = arith.constant 0.000000e+00 : f32
    %29 = vector.broadcast %cst_10 : f32 to vector<16x256xf32>
    %30 = arith.maximumf %28, %29 : vector<16x256xf32>
    %31 = arith.truncf %30 : vector<16x256xf32> to vector<16x256xbf16>
    %c0_11 = arith.constant 0 : index
    %c0_12 = arith.constant 0 : index
    %32 = vector.load %arg3[%c0_11, %c0_12] : memref<256x128xbf16, #tpu.memory_space<vmem>>, vector<256x128xbf16>
    %cst_13 = arith.constant dense<0.000000e+00> : vector<16x128xf32>
    %33 = tpu.matmul %31, %32, %cst_13 {dimension_numbers = #tpu.dot_dimension_numbers<[1], [0], [0], [1], [0, 0, 1, 1], [], []>} : vector<16x256xbf16>, vector<256x128xbf16>, vector<16x128xf32> -> vector<16x128xf32>
    %34 = vector.broadcast %4 : vector<1x128xf32> to vector<16x128xf32>
    %35 = arith.addf %33, %34 : vector<16x128xf32>
    %c0_14 = arith.constant 0 : index
    %c0_15 = arith.constant 0 : index
    %36 = vector.load %arg6[%c0_14, %c0_15] : memref<128x128xbf16, #tpu.memory_space<vmem>>, vector<128x128xbf16>
    %37 = arith.truncf %35 : vector<16x128xf32> to vector<16x128xbf16>
    %cst_16 = arith.constant dense<0.000000e+00> : vector<16x128xf32>
    %38 = tpu.matmul %37, %36, %cst_16 {dimension_numbers = #tpu.dot_dimension_numbers<[1], [0], [0], [1], [0, 0, 1, 1], [], []>} : vector<16x128xbf16>, vector<128x128xbf16>, vector<16x128xf32> -> vector<16x128xf32>
    %39 = arith.subf %35, %38 : vector<16x128xf32>
    %40 = arith.mulf %39, %39 : vector<16x128xf32>
    %41 = arith.truncf %40 : vector<16x128xf32> to vector<16x128xbf16>
    %cst_17 = arith.constant dense<0.000000e+00> : vector<16x128xf32>
    %42 = tpu.matmul %41, %36, %cst_17 {dimension_numbers = #tpu.dot_dimension_numbers<[1], [0], [0], [1], [0, 0, 1, 1], [], []>} : vector<16x128xbf16>, vector<128x128xbf16>, vector<16x128xf32> -> vector<16x128xf32>
    %cst_18 = arith.constant 9.99999974E-6 : f32
    %43 = vector.broadcast %cst_18 : f32 to vector<16x128xf32>
    %44 = arith.addf %42, %43 : vector<16x128xf32>
    %45 = math.rsqrt %44 : vector<16x128xf32>
    %46 = arith.mulf %39, %45 : vector<16x128xf32>
    %47 = vector.broadcast %5 : vector<1x128xf32> to vector<16x128xf32>
    %48 = arith.mulf %46, %47 : vector<16x128xf32>
    %49 = vector.broadcast %6 : vector<1x128xf32> to vector<16x128xf32>
    %50 = arith.addf %48, %49 : vector<16x128xf32>
    %cst_19 = arith.constant 0.000000e+00 : f32
    %51 = vector.broadcast %cst_19 : f32 to vector<16x128xf32>
    %52 = arith.maximumf %50, %51 : vector<16x128xf32>
    %53 = arith.truncf %52 : vector<16x128xf32> to vector<16x128xbf16>
    %c0_20 = arith.constant 0 : index
    %c0_21 = arith.constant 0 : index
    %54 = vector.load %arg4[%c0_20, %c0_21] : memref<128x128xbf16, #tpu.memory_space<vmem>>, vector<128x128xbf16>
    %cst_22 = arith.constant dense<0.000000e+00> : vector<16x128xf32>
    %55 = tpu.matmul %53, %54, %cst_22 {dimension_numbers = #tpu.dot_dimension_numbers<[1], [0], [0], [1], [0, 0, 1, 1], [], []>} : vector<16x128xbf16>, vector<128x128xbf16>, vector<16x128xf32> -> vector<16x128xf32>
    %56 = vector.broadcast %7 : vector<1x128xf32> to vector<16x128xf32>
    %57 = arith.addf %55, %56 : vector<16x128xf32>
    %58 = arith.truncf %57 : vector<16x128xf32> to vector<16x128xbf16>
    %c0_23 = arith.constant 0 : index
    %c0_24 = arith.constant 0 : index
    %59 = vector.load %arg8[%c0_23, %c0_24] : memref<16x128xbf16, #tpu.memory_space<vmem>>, vector<16x128xbf16>
    tpu.vector_store %arg8[%c0_23, %c0_24], %58 {strides = array<i32>} : memref<16x128xbf16, #tpu.memory_space<vmem>>, vector<16x128xbf16>,
    return
  }
  func.func @transform_0(%arg0: i32) -> (i32, i32) {
    %c0_i32 = arith.constant 0 : i32
    %c0_i32_0 = arith.constant 0 : i32
    return %arg0, %c0_i32 : i32, i32
  }
  func.func @transform_1(%arg0: i32) -> (i32, i32) {
    %c0_i32 = arith.constant 0 : i32
    %c0_i32_0 = arith.constant 0 : i32
    %c0_i32_1 = arith.constant 0 : i32
    return %c0_i32, %c0_i32_0 : i32, i32
  }
  func.func @transform_2(%arg0: i32) -> (i32, i32) {
    %c0_i32 = arith.constant 0 : i32
    %c0_i32_0 = arith.constant 0 : i32
    %c0_i32_1 = arith.constant 0 : i32
    return %c0_i32, %c0_i32_0 : i32, i32
  }
  func.func @transform_3(%arg0: i32) -> (i32, i32) {
    %c0_i32 = arith.constant 0 : i32
    %c0_i32_0 = arith.constant 0 : i32
    %c0_i32_1 = arith.constant 0 : i32
    return %c0_i32, %c0_i32_0 : i32, i32
  }
  func.func @transform_4(%arg0: i32) -> (i32, i32) {
    %c0_i32 = arith.constant 0 : i32
    %c0_i32_0 = arith.constant 0 : i32
    %c0_i32_1 = arith.constant 0 : i32
    return %c0_i32, %c0_i32_0 : i32, i32
  }
  func.func @transform_5(%arg0: i32) -> (i32, i32) {
    %c0_i32 = arith.constant 0 : i32
    %c0_i32_0 = arith.constant 0 : i32
    %c0_i32_1 = arith.constant 0 : i32
    return %c0_i32, %c0_i32_0 : i32, i32
  }
  func.func @transform_6(%arg0: i32) -> (i32, i32) {
    %c0_i32 = arith.constant 0 : i32
    %c0_i32_0 = arith.constant 0 : i32
    %c0_i32_1 = arith.constant 0 : i32
    return %c0_i32, %c0_i32_0 : i32, i32
  }
  func.func @transform_7(%arg0: i32) -> (i32, i32) {
    %c0_i32 = arith.constant 0 : i32
    %c0_i32_0 = arith.constant 0 : i32
    return %arg0, %c0_i32 : i32, i32
  }
}

</mosaic_0001>

<bundles_post_ra>
// kernel: activity_classifier_forward.1
= control target key start
LH: loop header
LB: loop body
LE: loop exit
PB: predicated region body
PF: predicated region fallthrough
CT: control target
= control target key end

     0   :  { %12 = vsyncpa [#allocation3], 0  ;;  %s1833_s0 = inlined_call_operand.vmem [shape: f32[16,256], index: 0, kind: input, shape index: {}]   ;;  %s1834_s1 = inlined_call_operand.hbm [shape: bf16[256,256], index: 1, kind: input, shape index: {}]   ;;  %s1835_s2 = inlined_call_operand.hbm [shape: bf16[256,128], index: 2, kind: input, shape index: {}]   ;;  %s1836_s3 = inlined_call_operand.hbm [shape: bf16[128,128], index: 3, kind: input, shape index: {}]   ;;  %s1837_s4 = inlined_call_operand.hbm [shape: bf16[256,256], index: 4, kind: input, shape index: {}]   ;;  %s1838_s5 = inlined_call_operand.hbm [shape: bf16[128,128], index: 5, kind: input, shape index: {}]   ;;  %s1839_s6 = inlined_call_operand.vmem [shape: f32[8,256], index: 6, kind: input, shape index: {}]   ;;  %s1840_s7 = inlined_call_operand.vmem [shape: bf16[16,128], index: 7, kind: output, shape index: {}]  }
   0x1   :  { %13 = vsyncpa [#allocation5], 0 }
   0x2   :  { %14 = vsyncpa [#allocation8], 0  ;;  %s1615_s24 = smov [#allocation4]  }
   0x3   :  { %s34_s25 = sshll.u32 %s1615_s24, 4  ;;  %s35_s25 = int_to_ptr.vmem [resolvable:$true] %s34_s25 }
   0x4   :  { %s1517_s26 = scalar_lea.vmem %s35_s25, 2048  ;;  %p1522_p1 = scmp.lt.s32.totalorder %s35_s25, %s35_s25 }
   0x5   :  { %p1518_p0 = scmp.ne.s32.totalorder %s35_s25, %s1517_s26  ;;  %p1523_p2 = scmp.lt.s32.totalorder %s1517_s26, %s1517_s26 }
   0x7   :  { %p1524_p3 = por %p1523_p2, %p1522_p1 }
   0x9   :  { %p1525_p4 = pnand %p1524_p3, %p1518_p0 }
   0xb   :  { %1528 = shalt.err (!%p1525_p4)
}
   0xc   :  { %s1616_s27 = smov 64   ;;  %s1617_s28 = smov 4  }
   0xd   :  { %40 = dma.hbm_to_vmem [thread:$0]  %s1835_s2, 2048, %s35_s25, [#allocation5], %s1616_s27, %s1616_s27, %s1617_s28  }
   0xe   :  { %s1618_s8 = smov [#allocation7]   ;;  %s1619_s10 = smov [#allocation2]  }
   0xf   :  { %s58_s9 = sshll.u32 %s1618_s8, 4  ;;  %s22_s11 = sshll.u32 %s1619_s10, 4  ;;  %s59_s9 = int_to_ptr.vmem [resolvable:$true] %s58_s9  ;;  %s23_s11 = int_to_ptr.vmem [resolvable:$true] %s22_s11 }
  0x10   :  { %s1537_s12 = scalar_lea.vmem %s59_s9, 4096  ;;  %p1542_p6 = scmp.lt.s32.totalorder %s59_s9, %s59_s9 }
  0x11   :  { %p1538_p5 = scmp.ne.s32.totalorder %s59_s9, %s1537_s12  ;;  %p1543_p7 = scmp.lt.s32.totalorder %s1537_s12, %s1537_s12 }
  0x13   :  { %p1544_p8 = por %p1543_p7, %p1542_p6 }
  0x15   :  { %p1545_p9 = pnand %p1544_p8, %p1538_p5 }
  0x17   :  { %1548 = shalt.err (!%p1545_p9)
}
  0x18   :  { %s1620_s13 = smov 128   ;;  %s1621_s14 = smov 8  }
  0x19   :  { %64 = dma.hbm_to_vmem [thread:$0]  %s1837_s4, 4096, %s59_s9, [#allocation8], %s1620_s13, %s1620_s13, %s1621_s14  }
  0x1a   :  { %s1557_s2 = scalar_lea.vmem %s23_s11, 4096  ;;  %p1562_p11 = scmp.lt.s32.totalorder %s23_s11, %s23_s11 }
  0x1b   :  { %p1558_p10 = scmp.ne.s32.totalorder %s23_s11, %s1557_s2  ;;  %p1563_p12 = scmp.lt.s32.totalorder %s1557_s2, %s1557_s2 }
  0x1d   :  { %p1564_p13 = por %p1563_p12, %p1562_p11 }
  0x1f   :  { %p1565_p0 = pnand %p1564_p13, %p1558_p10 }
  0x21   :  { %1568 = shalt.err (!%p1565_p0)
}
  0x22   :  { %28 = dma.hbm_to_vmem [thread:$0]  %s1834_s1, 4096, %s23_s11, [#allocation3], %s1620_s13, %s1620_s13, %s1621_s14  }
  0x23   :  { %s1622_s19 = smov [#allocation6]   ;;  %s1623_s21 = smov [#allocation9]  }
  0x24   :  { %s46_s20 = sshll.u32 %s1622_s19, 4  ;;  %s70_s22 = sshll.u32 %s1623_s21, 4  ;;  %s47_s20 = int_to_ptr.vmem [resolvable:$true] %s46_s20  ;;  %s71_s22 = int_to_ptr.vmem [resolvable:$true] %s70_s22 }
  0x25   :  { %s1577_s23 = scalar_lea.vmem %s47_s20, 1024  ;;  %p1582_p2 = scmp.lt.s32.totalorder %s47_s20, %s47_s20 }
  0x26   :  { %p1578_p1 = scmp.ne.s32.totalorder %s47_s20, %s1577_s23  ;;  %p1583_p3 = scmp.lt.s32.totalorder %s1577_s23, %s1577_s23 }
  0x28   :  { %p1584_p4 = por %p1583_p3, %p1582_p2 }
  0x2a   :  { %p1585_p5 = pnand %p1584_p4, %p1578_p1 }
  0x2c   :  { %1588 = shalt.err (!%p1585_p5)
}
  0x2d   :  { %52 = dma.hbm_to_vmem [thread:$0]  %s1836_s3, 1024, %s47_s20, [#allocation5], %s1616_s27, %s1616_s27, %s1617_s28  }
  0x2e   :  { %s1597_s1 = scalar_lea.vmem %s71_s22, 1024  ;;  %p1602_p7 = scmp.lt.s32.totalorder %s71_s22, %s71_s22 }
  0x2f   :  { %p1598_p6 = scmp.ne.s32.totalorder %s71_s22, %s1597_s1  ;;  %p1603_p8 = scmp.lt.s32.totalorder %s1597_s1, %s1597_s1 }
  0x31   :  { %p1604_p9 = por %p1603_p8, %p1602_p7 }
  0x33   :  { %p1605_p10 = pnand %p1604_p9, %p1598_p6 }
  0x35   :  { %1608 = shalt.err (!%p1605_p10)
}
  0x36   :  { %76 = dma.hbm_to_vmem [thread:$0]  %s1838_s5, 1024, %s71_s22, [#allocation8], %s1616_s27, %s1616_s27, %s1617_s28  }
  0x37   :  { %1609 = dma.done.wait [#allocation3], 4096  }
  0x38   :  { %1610 = vsyncadd [#allocation3], 4294963200 }
  0x39   :  { %1611 = dma.done.wait [#allocation5], 3072  }
  0x3a   :  { %1612 = vsyncadd [#allocation5], 4294964224 }
  0x3b   :  { %1613 = dma.done.wait [#allocation8], 5120  }
  0x3c   :  { %1614 = vsyncadd [#allocation8], 4294962176  ;;  %v1369_v0 = vld [vmem:[#allocation2 + $0x74] ss:$8 sps:$4 sm:$0xff]   ;;  %v1371_v1 = vld [vmem:[#allocation2 + $0x70] ss:$8 sps:$4 sm:$0xff]  }
  0x3d   :  { %303 = vmatprep.subr.bf16.mxu0 %v1369_v0  ;;  %v1372_v2 = vld [vmem:[#allocation2 + $0x64] ss:$8 sps:$4 sm:$0xff]   ;;  %v1374_v3 = vld [vmem:[#allocation2 + $0x60] ss:$8 sps:$4 sm:$0xff]   ;;  %v1375_v4 = vld [vmem:[#allocation2 + $0x54] ss:$8 sps:$4 sm:$0xff]  }
  0x3e   :  { %304 = vmatpush1.bf16.msra.mxu0 %v1371_v1  ;;  %v1377_v5 = vld [vmem:[#allocation2 + $0x50] ss:$8 sps:$4 sm:$0xff]   ;;  %v1378_v6 = vld [vmem:[#allocation2 + $0x44] ss:$8 sps:$4 sm:$0xff]   ;;  %v1380_v7 = vld [vmem:[#allocation2 + $0x40] ss:$8 sps:$4 sm:$0xff]  }
  0x3f   :  { %305 = vmatprep.subr.bf16.mxu0 %v1372_v2  ;;  %v1381_v8 = vld [vmem:[#allocation2 + $0x34] ss:$8 sps:$4 sm:$0xff]   ;;  %v1383_v9 = vld [vmem:[#allocation2 + $0x30] ss:$8 sps:$4 sm:$0xff]   ;;  %v1384_v10 = vld [vmem:[#allocation2 + $0x24] ss:$8 sps:$4 sm:$0xff]  }
  0x40   :  { %v1386_v11 = vld [vmem:[#allocation2 + $0x20] ss:$8 sps:$4 sm:$0xff]   ;;  %v1387_v12 = vld [vmem:[#allocation2 + $0x14] ss:$8 sps:$4 sm:$0xff]   ;;  %v1389_v15 = vld [vmem:[#allocation2 + $0x10] ss:$8 sps:$4 sm:$0xff]  }
  0x41   :  { %v98_v13 = vld [vmem:[%s1833_s0 + $0x8] sm:$0xff]  ;;  %v100_v14 = vld [vmem:[%s1833_s0 + $0x18] sm:$0xff]  ;;  %v97_v55 = vld [vmem:[%s1833_s0] sm:$0xff]  ;;  %vm1625_vm0 = vmmov 0  }
  0x42   :  { %306 = vmatpush1.bf16.msra.mxu0 %v1374_v3  ;;  %v1390_v16 = vld [vmem:[#allocation2 + $0x4] ss:$8 sps:$4 sm:$0xff]   ;;  %v102_v17 = vpack.c.bf16 %v100_v14, %v98_v13  ;;  %v1696_v18 = vld [vmem:[#allocation7 + $0x74] ss:$8 sps:$4 sm:$0xff]   ;;  %v1698_v19 = vld [vmem:[#allocation7 + $0x70] ss:$8 sps:$4 sm:$0xff]  }
  0x43   :  { %307 = vmatprep.subr.bf16.mxu0 %v1375_v4  ;;  %v1700_v20 = vld [vmem:[#allocation7 + $0x64] ss:$8 sps:$4 sm:$0xff]   ;;  %540 = vmatprep.subr.bf16.mxu1 %v1696_v18  ;;  %v1704_v21 = vld [vmem:[#allocation7 + $0x60] ss:$8 sps:$4 sm:$0xff]   ;;  %v1707_v23 = vld [vmem:[#allocation7 + $0x54] ss:$8 sps:$4 sm:$0xff]  }
  0x44   :  { %335 = vmatprep.mubr.bf16.mxu0 %v102_v17  ;;  %541 = vmatpush1.bf16.msra.mxu1 %v1698_v19  ;;  %v1392_v22 = vld [vmem:[#allocation2] ss:$8 sps:$4 sm:$0xff]   ;;  %v1393_v24 = vld [vmem:[#allocation2 + $0xf4] ss:$8 sps:$4 sm:$0xff]   ;;  %v1710_v25 = vld [vmem:[#allocation7 + $0x50] ss:$8 sps:$4 sm:$0xff]  }
  0x45   :  { %542 = vmatprep.subr.bf16.mxu1 %v1700_v20  ;;  %v1395_v26 = vld [vmem:[#allocation2 + $0xf0] ss:$8 sps:$4 sm:$0xff]   ;;  %v1713_v27 = vld [vmem:[#allocation7 + $0x44] ss:$8 sps:$4 sm:$0xff]   ;;  %v1716_v29 = vld [vmem:[#allocation7 + $0x40] ss:$8 sps:$4 sm:$0xff]  }
  0x46   :  { %308 = vmatpush1.bf16.msra.mxu0 %v1377_v5  ;;  %v1396_v28 = vld [vmem:[#allocation2 + $0xe4] ss:$8 sps:$4 sm:$0xff]   ;;  %v1398_v30 = vld [vmem:[#allocation2 + $0xe0] ss:$8 sps:$4 sm:$0xff]   ;;  %v1719_v31 = vld [vmem:[#allocation7 + $0x34] ss:$8 sps:$4 sm:$0xff]  }
  0x47   :  { %309 = vmatprep.subr.bf16.mxu0 %v1378_v6  ;;  %v1399_v32 = vld [vmem:[#allocation2 + $0xd4] ss:$8 sps:$4 sm:$0xff]   ;;  %v1401_v33 = vld [vmem:[#allocation2 + $0xd0] ss:$8 sps:$4 sm:$0xff]   ;;  %v1402_v35 = vld [vmem:[#allocation2 + $0xc4] ss:$8 sps:$4 sm:$0xff]   ;;  %v135_v6 = vlaneseq }
  0x48   :  { %543 = vmatpush1.bf16.msra.mxu1 %v1704_v21  ;;  %v1722_v34 = vld [vmem:[#allocation7 + $0x30] ss:$8 sps:$4 sm:$0xff]   ;;  %v1725_v36 = vld [vmem:[#allocation7 + $0x24] ss:$8 sps:$4 sm:$0xff]   ;;  %v1727_v37 = vld [vmem:[#allocation7 + $0x20] ss:$8 sps:$4 sm:$0xff]  }
  0x49   :  { %544 = vmatprep.subr.bf16.mxu1 %v1707_v23  ;;  %v1404_v38 = vld [vmem:[#allocation2 + $0xc0] ss:$8 sps:$4 sm:$0xff]   ;;  %v1729_v39 = vld [vmem:[#allocation7 + $0x14] ss:$8 sps:$4 sm:$0xff]   ;;  %v1437_v41 = vld [vmem:[#allocation7 + $0x10] ss:$8 sps:$4 sm:$0xff]  }
  0x4a   :  { %310 = vmatpush1.bf16.msra.mxu0 %v1380_v7  ;;  %v1405_v40 = vld [vmem:[#allocation2 + $0xb4] ss:$8 sps:$4 sm:$0xff]   ;;  %v1407_v42 = vld [vmem:[#allocation2 + $0xb0] ss:$8 sps:$4 sm:$0xff]   ;;  %v1438_v43 = vld [vmem:[#allocation7 + $0x4] ss:$8 sps:$4 sm:$0xff]  }
  0x4b   :  { %311 = vmatprep.subr.bf16.mxu0 %v1381_v8  ;;  %v1408_v44 = vld [vmem:[#allocation2 + $0xa4] ss:$8 sps:$4 sm:$0xff]   ;;  %v1440_v45 = vld [vmem:[#allocation7] ss:$8 sps:$4 sm:$0xff]   ;;  %v1441_v47 = vld [vmem:[#allocation7 + $0xf4] ss:$8 sps:$4 sm:$0xff]  }
  0x4c   :  { %545 = vmatpush1.bf16.msra.mxu1 %v1710_v25  ;;  %v1410_v46 = vld [vmem:[#allocation2 + $0xa0] ss:$8 sps:$4 sm:$0xff]   ;;  %v1411_v48 = vld [vmem:[#allocation2 + $0x94] ss:$8 sps:$4 sm:$0xff]   ;;  %v1443_v49 = vld [vmem:[#allocation7 + $0xf0] ss:$8 sps:$4 sm:$0xff]  }
  0x4d   :  { %546 = vmatprep.subr.bf16.mxu1 %v1713_v27  ;;  %v1413_v50 = vld [vmem:[#allocation2 + $0x90] ss:$8 sps:$4 sm:$0xff]   ;;  %v1444_v51 = vld [vmem:[#allocation7 + $0xe4] ss:$8 sps:$4 sm:$0xff]   ;;  %v1446_v53 = vld [vmem:[#allocation7 + $0xe0] ss:$8 sps:$4 sm:$0xff]  }
  0x4e   :  { %312 = vmatpush1.bf16.msra.mxu0 %v1383_v9  ;;  %v1414_v52 = vld [vmem:[#allocation2 + $0x84] ss:$8 sps:$4 sm:$0xff]   ;;  %v1416_v54 = vld [vmem:[#allocation2 + $0x80] ss:$8 sps:$4 sm:$0xff]   ;;  %v99_v56 = vld [vmem:[%s1833_s0 + $0x10] sm:$0xff]  ;;  %v1754_v7 = vshrl.u32 %v135_v6, 7 }
  0x4f   :  { %313 = vmatprep.subr.bf16.mxu0 %v1384_v10  ;;  %v1447_v57 = vld [vmem:[#allocation7 + $0xd4] ss:$8 sps:$4 sm:$0xff]   ;;  %v1449_v58 = vld [vmem:[#allocation7 + $0xd0] ss:$8 sps:$4 sm:$0xff]   ;;  %v101_v59 = vpack.c.bf16 %v99_v56, %v97_v55  ;;  %v1450_v60 = vld [vmem:[#allocation7 + $0xc4] ss:$8 sps:$4 sm:$0xff]  }
  0x50   :  { %547 = vmatpush1.bf16.msra.mxu1 %v1716_v29  ;;  %v1452_v61 = vld [vmem:[#allocation7 + $0xc0] ss:$8 sps:$4 sm:$0xff]   ;;  %v1453_v62 = vld [vmem:[#allocation7 + $0xb4] ss:$8 sps:$4 sm:$0xff]   ;;  %v1455_v63 = vld [vmem:[#allocation7 + $0xb0] ss:$8 sps:$4 sm:$0xff]  }
  0x51   :  { %548 = vmatprep.subr.bf16.mxu1 %v1719_v31  ;;  %v1456_v0 = vld [vmem:[#allocation7 + $0xa4] ss:$8 sps:$4 sm:$0xff]   ;;  %v1458_v1 = vld [vmem:[#allocation7 + $0xa0] ss:$8 sps:$4 sm:$0xff]   ;;  %v1459_v2 = vld [vmem:[#allocation7 + $0x94] ss:$8 sps:$4 sm:$0xff]  }
  0x52   :  { %314 = vmatpush1.bf16.msra.mxu0 %v1386_v11  ;;  %v1461_v3 = vld [vmem:[#allocation7 + $0x90] ss:$8 sps:$4 sm:$0xff]   ;;  %v1462_v4 = vld [vmem:[#allocation7 + $0x84] ss:$8 sps:$4 sm:$0xff]   ;;  %v1464_v5 = vld [vmem:[#allocation7 + $0x80] ss:$8 sps:$4 sm:$0xff]  }
  0x53   :  { %315 = vmatprep.subr.bf16.mxu0 %v1387_v12  ;;  %v137_v8 = vsub.s32 0, %v1754_v7  ;;  %v1760_v10 = vld [vmem:[%s1839_s6 + $0x8] sm:$0xff]  ;;  %v1765_v11 = vld [vmem:[%s1839_s6] sm:$0xff]  ;;  %v1482_v55 = vld [vmem:[#allocation9 + $0x30] sm:$0xff]  }
  0x54   :  { %549 = vmatpush1.bf16.msra.mxu1 %v1722_v34  ;;  %v1483_v56 = vld [vmem:[#allocation9 + $0x28] sm:$0xff]  }
  0x55   :  { %550 = vmatprep.subr.bf16.mxu1 %v1725_v36  ;;  %v142_v13 = vrot.slane %v1760_v10, %v137_v8  ;;  %v138_v14 = vrot.slane %v1765_v11, %v137_v8 }
  0x56   :  { %316 = vmatpush1.bf16.msra.mxu0 %v1389_v15 }
  0x57   :  { %317 = vmatprep.subr.bf16.mxu0 %v1390_v16 }
  0x58   :  { %551 = vmatpush1.bf16.msra.mxu1 %v1727_v37 }
  0x59   :  { %552 = vmatprep.subr.bf16.mxu1 %v1729_v39 }
  0x5a   :  { %318 = vmatpush1.bf16.msra.mxu0 %v1392_v22 }
  0x5b   :  { %319 = vmatprep.subr.bf16.mxu0 %v1393_v24 }
  0x5c   :  { %553 = vmatpush1.bf16.msra.mxu1 %v1437_v41 }
  0x5d   :  { %554 = vmatprep.subr.bf16.mxu1 %v1438_v43 }
  0x5e   :  { %320 = vmatpush2.bf16.msra.mxu0 %v1395_v26 }
  0x5f   :  { %321 = vmatprep.subr.bf16.mxu0 %v1396_v28 }
  0x60   :  { %555 = vmatpush1.bf16.msra.mxu1 %v1440_v45 }
  0x61   :  { %556 = vmatprep.subr.bf16.mxu1 %v1441_v47 }
  0x62   :  { %322 = vmatpush2.bf16.msra.mxu0 %v1398_v30 }
  0x63   :  { %323 = vmatprep.subr.bf16.mxu0 %v1399_v32 }
  0x64   :  { %557 = vmatpush2.bf16.msra.mxu1 %v1443_v49 }
  0x65   :  { %558 = vmatprep.subr.bf16.mxu1 %v1444_v51 }
  0x66   :  { %324 = vmatpush2.bf16.msra.mxu0 %v1401_v33 }
  0x67   :  { %325 = vmatprep.subr.bf16.mxu0 %v1402_v35 }
  0x68   :  { %559 = vmatpush2.bf16.msra.mxu1 %v1446_v53 }
  0x69   :  { %560 = vmatprep.subr.bf16.mxu1 %v1447_v57 }
  0x6a   :  { %326 = vmatpush2.bf16.msra.mxu0 %v1404_v38  ;;  %v1466_v38 = vld [vmem:[#allocation4 + $0x38] sm:$0xff]  }
  0x6b   :  { %327 = vmatprep.subr.bf16.mxu0 %v1405_v40  ;;  %v1468_v40 = vld [vmem:[#allocation4 + $0x30] sm:$0xff]  }
  0x6c   :  { %561 = vmatpush2.bf16.msra.mxu1 %v1449_v58 }
  0x6d   :  { %562 = vmatprep.subr.bf16.mxu1 %v1450_v60 }
  0x6e   :  { %328 = vmatpush2.bf16.msra.mxu0 %v1407_v42  ;;  %v1470_v42 = vld [vmem:[#allocation4 + $0x28] sm:$0xff]  }
  0x6f   :  { %329 = vmatprep.subr.bf16.mxu0 %v1408_v44  ;;  %v1472_v44 = vld [vmem:[#allocation4 + $0x20] sm:$0xff]  }
  0x70   :  { %563 = vmatpush2.bf16.msra.mxu1 %v1452_v61 }
  0x71   :  { %564 = vmatprep.subr.bf16.mxu1 %v1453_v62 }
  0x72   :  { %330 = vmatpush2.bf16.msra.mxu0 %v1410_v46  ;;  %v1474_v46 = vld [vmem:[#allocation4 + $0x18] sm:$0xff]  }
  0x73   :  { %331 = vmatprep.subr.bf16.mxu0 %v1411_v48  ;;  %v1476_v48 = vld [vmem:[#allocation4 + $0x10] sm:$0xff]  }
  0x74   :  { %565 = vmatpush2.bf16.msra.mxu1 %v1455_v63 }
  0x75   :  { %566 = vmatprep.subr.bf16.mxu1 %v1456_v0 }
  0x76   :  { %332 = vmatpush2.bf16.msra.mxu0 %v1413_v50  ;;  %v1478_v50 = vld [vmem:[#allocation4 + $0x8] sm:$0xff]  }
  0x77   :  { %333 = vmatprep.subr.bf16.mxu0 %v1414_v52  ;;  %v1480_v52 = vld [vmem:[#allocation4] sm:$0xff]  }
  0x78   :  { %567 = vmatpush2.bf16.msra.mxu1 %v1458_v1 }
  0x79   :  { %568 = vmatprep.subr.bf16.mxu1 %v1459_v2 }
  0x7a   :  { %334 = vmatpush2.bf16.msra.mxu0 %v1416_v54  ;;  %v1624_v54 = vmov 0.0  }
  0x7b   :  { %593 = vmatprep.subr.bf16.mxu0 %v1696_v18 }
  0x7c   :  { %569 = vmatpush2.bf16.msra.mxu1 %v1461_v3 }
  0x7d   :  { %336 = vmatmul.mubr.bf16.vlgmr.msra.gmra.mxu0 %v101_v59  ;;  %570 = vmatprep.subr.bf16.mxu1 %v1462_v4 }
  0x7e   :  { %594 = vmatpush1.bf16.msra.mxu0 %v1698_v19 }
  0x7f   :  { %595 = vmatprep.subr.bf16.mxu0 %v1700_v20 }
  0x80   :  { %571 = vmatpush2.bf16.msra.mxu1 %v1464_v5 }
  0x82   :  { %596 = vmatpush1.bf16.msra.mxu0 %v1704_v21 }
  0x83   :  { %597 = vmatprep.subr.bf16.mxu0 %v1707_v23 }
  0x86   :  { %598 = vmatpush1.bf16.msra.mxu0 %v1710_v25 }
  0x87   :  { %599 = vmatprep.subr.bf16.mxu0 %v1713_v27 }
  0x8a   :  { %600 = vmatpush1.bf16.msra.mxu0 %v1716_v29 }
  0x8b   :  { %601 = vmatprep.subr.bf16.mxu0 %v1719_v31 }
  0x8e   :  { %602 = vmatpush1.bf16.msra.mxu0 %v1722_v34 }
  0x8f   :  { %603 = vmatprep.subr.bf16.mxu0 %v1725_v36 }
  0x92   :  { %604 = vmatpush1.bf16.msra.mxu0 %v1727_v37  ;;  %v1465_v37 = vld [vmem:[#allocation4 + $0x78] sm:$0xff]  }
  0x93   :  { %605 = vmatprep.subr.bf16.mxu0 %v1729_v39  ;;  %1249 = vmatprep.subr.bf16.mxu1 %v1465_v37  ;;  %v1467_v39 = vld [vmem:[#allocation4 + $0x70] sm:$0xff]   ;;  %v708_v37 = vsub.s32 3, %v1754_v7 }
  0x96   :  { %606 = vmatpush1.bf16.msra.mxu0 %v1437_v41  ;;  %v1469_v41 = vld [vmem:[#allocation4 + $0x68] sm:$0xff]  }
  0x97   :  { %607 = vmatprep.subr.bf16.mxu0 %v1438_v43  ;;  %v1471_v43 = vld [vmem:[#allocation4 + $0x60] sm:$0xff]  }
  0x9a   :  { %608 = vmatpush1.bf16.msra.mxu0 %v1440_v45  ;;  %v1473_v45 = vld [vmem:[#allocation4 + $0x58] sm:$0xff]  }
  0x9b   :  { %609 = vmatprep.subr.bf16.mxu0 %v1441_v47  ;;  %v1475_v47 = vld [vmem:[#allocation4 + $0x50] sm:$0xff]  }
  0x9e   :  { %610 = vmatpush2.bf16.msra.mxu0 %v1443_v49  ;;  %v1477_v49 = vld [vmem:[#allocation4 + $0x48] sm:$0xff]  }
  0x9f   :  { %611 = vmatprep.subr.bf16.mxu0 %v1444_v51  ;;  %v1479_v51 = vld [vmem:[#allocation4 + $0x40] sm:$0xff]  }
  0xa2   :  { %612 = vmatpush2.bf16.msra.mxu0 %v1446_v53  ;;  %v1481_v53 = vld [vmem:[#allocation9 + $0x38] sm:$0xff]  }
  0xa3   :  { %613 = vmatprep.subr.bf16.mxu0 %v1447_v57  ;;  %v1484_v57 = vld [vmem:[#allocation9 + $0x20] sm:$0xff]  }
  0xa6   :  { %614 = vmatpush2.bf16.msra.mxu0 %v1449_v58  ;;  %v1485_v58 = vld [vmem:[#allocation9 + $0x18] sm:$0xff]  }
  0xa7   :  { %615 = vmatprep.subr.bf16.mxu0 %v1450_v60 }
  0xaa   :  { %616 = vmatpush2.bf16.msra.mxu0 %v1452_v61 }
  0xab   :  { %617 = vmatprep.subr.bf16.mxu0 %v1453_v62 }
  0xae   :  { %618 = vmatpush2.bf16.msra.mxu0 %v1455_v63 }
  0xaf   :  { %619 = vmatprep.subr.bf16.mxu0 %v1456_v0 }
  0xb2   :  { %620 = vmatpush2.bf16.msra.mxu0 %v1458_v1 }
  0xb3   :  { %621 = vmatprep.subr.bf16.mxu0 %v1459_v2 }
  0xb6   :  { %622 = vmatpush2.bf16.msra.mxu0 %v1461_v3  ;;  %v646_v3 = vsub.s32 1, %v1754_v7 }
  0xb7   :  { %623 = vmatprep.subr.bf16.mxu0 %v1462_v4 }
  0xb8   :  { %v647_v8 = vrot.slane %v1765_v11, %v646_v3 }
  0xba   :  { %624 = vmatpush2.bf16.msra.mxu0 %v1464_v5  ;;  %v651_v5 = vrot.slane %v1760_v10, %v646_v3 }
  0xbb   :  { %1318 = vmatprep.subr.bf16.mxu0 %v1624_v54 }
 0x13d   :  { %v337_v9 = vpop.f32.mrf.mxu0 }
 0x13e   :  { %v338_v20 = vadd.f32 %v337_v9, %v138_v14  ;;  %v658_v9 = vsub.s32 2, %v1754_v7 }
 0x13f   :  { %v339_v12 = vpop.f32.mrf.mxu0 }
 0x140   :  { %v340_v18 = vadd.f32 %v339_v12, %v142_v13 }
 0x141   :  { %v341_v15 = vpop.f32.mrf.mxu0 }
 0x142   :  { %v342_v16 = vadd.f32 %v341_v15, %v138_v14  ;;  %v663_v15 = vrot.slane %v1760_v10, %v658_v9 }
 0x143   :  { %v343_v17 = vpop.f32.mrf.mxu0 }
 0x144   :  { %v344_v19 = vadd.f32 %v343_v17, %v142_v13  ;;  %v378_v22 = vpack.c.bf16 %v342_v16, %v338_v20 }
 0x146   :  { %v379_v21 = vpack.c.bf16 %v344_v19, %v340_v18 }
 0x148   :  { %572 = vmatprep.mubr.bf16.mxu1 %v379_v21 }
 0x149   :  { %573 = vmatmul.mubr.bf16.vlgmr.msra.gmra.mxu1 %v378_v22 }
 0x14a   :  { %1250 = vmatpush3.bf16.msra.mxu1 %v1466_v38 }
 0x14b   :  { %1251 = vmatprep.subr.bf16.mxu1 %v1467_v39 }
 0x14e   :  { %1252 = vmatpush3.bf16.msra.mxu1 %v1468_v40  ;;  %v709_v40 = vrot.slane %v1765_v11, %v708_v37 }
 0x14f   :  { %1253 = vmatprep.subr.bf16.mxu1 %v1469_v41 }
 0x152   :  { %1254 = vmatpush3.bf16.msra.mxu1 %v1470_v42 }
 0x153   :  { %1255 = vmatprep.subr.bf16.mxu1 %v1471_v43 }
 0x156   :  { %1256 = vmatpush3.bf16.msra.mxu1 %v1472_v44 }
 0x157   :  { %1257 = vmatprep.subr.bf16.mxu1 %v1473_v45 }
 0x15a   :  { %1258 = vmatpush3.bf16.msra.mxu1 %v1474_v46 }
 0x15b   :  { %1259 = vmatprep.subr.bf16.mxu1 %v1475_v47 }
 0x15e   :  { %1260 = vmatpush3.bf16.msra.mxu1 %v1476_v48 }
 0x15f   :  { %1261 = vmatprep.subr.bf16.mxu1 %v1477_v49 }
 0x162   :  { %1262 = vmatpush3.bf16.msra.mxu1 %v1478_v50 }
 0x163   :  { %1263 = vmatprep.subr.bf16.mxu1 %v1479_v51 }
 0x166   :  { %1264 = vmatpush3.bf16.msra.mxu1 %v1480_v52 }
 0x167   :  { %1298 = vmatprep.subr.bf16.mxu1 %v1624_v54 }
 0x209   :  { %v574_v23 = vpop.f32.mrf.mxu1 }
 0x20a   :  { %v1773_v28 = vsub.f32 %v338_v20, %v574_v23 }
 0x20b   :  { %v576_v24 = vpop.f32.mrf.mxu1 }
 0x20c   :  { %v1769_v26 = vsub.f32 %v340_v18, %v576_v24  ;;  %v587_v34 = vmul.f32 %v1773_v28, %v1773_v28 }
 0x20d   :  { %v578_v25 = vpop.f32.mrf.mxu1 }
 0x20e   :  { %v1771_v27 = vsub.f32 %v342_v16, %v578_v25  ;;  %v588_v32 = vmul.f32 %v1769_v26, %v1769_v26 }
 0x20f   :  { %v580_v29 = vpop.f32.mrf.mxu1 }
 0x210   :  { %v1775_v30 = vsub.f32 %v344_v19, %v580_v29  ;;  %v589_v31 = vmul.f32 %v1771_v27, %v1771_v27  ;;  %v659_v19 = vrot.slane %v1765_v11, %v658_v9 }
 0x212   :  { %v590_v33 = vmul.f32 %v1775_v30, %v1775_v30  ;;  %v591_v36 = vpack.c.bf16 %v589_v31, %v587_v34 }
 0x214   :  { %v592_v35 = vpack.c.bf16 %v590_v33, %v588_v32 }
 0x216   :  { %625 = vmatprep.mubr.bf16.mxu0 %v592_v35  ;;  %v1488_v35 = vld [vmem:[#allocation9] sm:$0xff]  }
 0x217   :  { %626 = vmatmul.mubr.bf16.vlgmr.msra.gmra.mxu0 %v591_v36 }
 0x218   :  { %1319 = vmatpush3.bf16.msra.mxu0 %v1481_v53  ;;  %1334 = vmatprep.mubr.msk.bf16.mxu0 %vm1625_vm0, %v1624_v54 }
 0x219   :  { %1320 = vmatprep.subr.bf16.mxu0 %v1624_v54 }
 0x21c   :  { %1321 = vmatpush3.bf16.msra.mxu0 %v1482_v55 }
 0x21d   :  { %1322 = vmatprep.subr.bf16.mxu0 %v1624_v54 }
 0x220   :  { %1323 = vmatpush3.bf16.msra.mxu0 %v1483_v56 }
 0x221   :  { %1324 = vmatprep.subr.bf16.mxu0 %v1624_v54 }
 0x224   :  { %1325 = vmatpush3.bf16.msra.mxu0 %v1484_v57 }
 0x225   :  { %1326 = vmatprep.subr.bf16.mxu0 %v1624_v54 }
 0x228   :  { %1327 = vmatpush3.bf16.msra.mxu0 %v1485_v58 }
 0x229   :  { %1328 = vmatprep.subr.bf16.mxu0 %v1624_v54 }
 0x2d7   :  { %v627_v59 = vpop.f32.mrf.mxu0 }
 0x2d8   :  { %v628_v60 = vadd.f32 1e-05, %v627_v59  ;;  %v1491_v59 = vld [vmem:[#allocation6 + $0x28] sm:$0xff]  }
 0x2d9   :  { %v629_v61 = vpop.f32.mrf.mxu0 }
 0x2da   :  { %1497 = vrsqrt.f32 %v628_v60  ;;  %v630_v62 = vadd.f32 1e-05, %v629_v61  ;;  %v1492_v60 = vld [vmem:[#allocation6 + $0x20] sm:$0xff]   ;;  %v1493_v61 = vld [vmem:[#allocation6 + $0x18] sm:$0xff]  }
 0x2db   :  { %v631_v63 = vpop.f32.mrf.mxu0 }
 0x2dc   :  { %1499 = vrsqrt.f32 %v630_v62  ;;  %v632_v0 = vadd.f32 1e-05, %v631_v63  ;;  %v1494_v62 = vld [vmem:[#allocation6 + $0x10] sm:$0xff]   ;;  %v1495_v63 = vld [vmem:[#allocation6 + $0x8] sm:$0xff]  }
 0x2dd   :  { %v633_v1 = vpop.f32.mrf.mxu0 }
 0x2de   :  { %1501 = vrsqrt.f32 %v632_v0  ;;  %v634_v2 = vadd.f32 1e-05, %v633_v1  ;;  %v1496_v0 = vld [vmem:[#allocation6] sm:$0xff]  }
 0x2e0   :  { %1503 = vrsqrt.f32 %v634_v2 }
 0x2e7   :  { %v1498_v4 = vpop.eup %1497 }
 0x2e8   :  { %v640_v12 = vmul.f32 %v1498_v4, %v1773_v28 }
 0x2e9   :  { %v1500_v6 = vpop.eup %1499 }
 0x2ea   :  { %v641_v13 = vmul.f32 %v1500_v6, %v1769_v26  ;;  %v652_v20 = vmul.f32 %v647_v8, %v640_v12  ;;  %v1011_v12 = vsub.s32 5, %v1754_v7 }
 0x2eb   :  { %v1502_v14 = vpop.eup %1501 }
 0x2ec   :  { %v653_v16 = vmul.f32 %v651_v5, %v641_v13  ;;  %v642_v17 = vmul.f32 %v1502_v14, %v1771_v27  ;;  %v664_v29 = vadd.f32 %v659_v19, %v652_v20  ;;  %v1486_v27 = vld [vmem:[#allocation9 + $0x10] sm:$0xff]  }
 0x2ed   :  { %v1504_v18 = vpop.eup %1503  ;;  %1329 = vmatpush3.bf16.msra.mxu0 %v1486_v27 }
 0x2ee   :  { %v643_v21 = vmul.f32 %v1504_v18, %v1775_v30  ;;  %v654_v22 = vmul.f32 %v647_v8, %v642_v17  ;;  %v665_v24 = vadd.f32 %v663_v15, %v653_v16  ;;  %v668_v33 = vmax.f32 %v664_v29, 0.0  ;;  %1330 = vmatprep.subr.bf16.mxu0 %v1624_v54  ;;  %v1487_v30 = vld [vmem:[#allocation9 + $0x8] sm:$0xff]  }
 0x2ef   :  { %v1005_v8 = vsub.s32 4, %v1754_v7 }
 0x2f0   :  { %v655_v23 = vmul.f32 %v651_v5, %v643_v21  ;;  %v666_v25 = vadd.f32 %v659_v19, %v654_v22  ;;  %v669_v26 = vmax.f32 %v665_v24, 0.0  ;;  %v1036_v24 = vsub.s32 6, %v1754_v7 }
 0x2f1   :  { %1331 = vmatpush3.bf16.msra.mxu0 %v1487_v30  ;;  %v1006_v9 = vrot.slane %v1765_v11, %v1005_v8 }
 0x2f2   :  { %v667_v28 = vadd.f32 %v663_v15, %v655_v23  ;;  %v670_v31 = vmax.f32 %v666_v25, 0.0  ;;  %1332 = vmatprep.subr.bf16.mxu0 %v1624_v54  ;;  %v1037_v29 = vrot.slane %v1765_v11, %v1036_v24 }
 0x2f4   :  { %v671_v32 = vmax.f32 %v667_v28, 0.0  ;;  %v672_v34 = vpack.c.bf16 %v670_v31, %v668_v33 }
 0x2f5   :  { %1333 = vmatpush3.bf16.msra.mxu0 %v1488_v35 }
 0x2f6   :  { %v673_v10 = vpack.c.bf16 %v671_v32, %v669_v26 }
 0x2f8   :  { %838 = vmatprep.mubr.bf16.mxu1 %v673_v10 }
 0x2f9   :  { %839 = vmatmul.mubr.bf16.vlgmr.msra.gmra.mxu1 %v672_v34 }
 0x2fa   :  { %1299 = vmatpush3.bf16.msra.mxu1 %v1481_v53  ;;  %1314 = vmatprep.mubr.msk.bf16.mxu1 %vm1625_vm0, %v1624_v54 }
 0x2fb   :  { %1300 = vmatprep.subr.bf16.mxu1 %v1624_v54 }
 0x2fe   :  { %1301 = vmatpush3.bf16.msra.mxu1 %v1482_v55 }
 0x2ff   :  { %1302 = vmatprep.subr.bf16.mxu1 %v1624_v54 }
 0x302   :  { %1303 = vmatpush3.bf16.msra.mxu1 %v1483_v56 }
 0x303   :  { %1304 = vmatprep.subr.bf16.mxu1 %v1624_v54 }
 0x306   :  { %1305 = vmatpush3.bf16.msra.mxu1 %v1484_v57  ;;  %v1489_v57 = vld [vmem:[#allocation6 + $0x38] sm:$0xff]  }
 0x307   :  { %1306 = vmatprep.subr.bf16.mxu1 %v1624_v54 }
 0x30a   :  { %1307 = vmatpush3.bf16.msra.mxu1 %v1485_v58  ;;  %v1490_v58 = vld [vmem:[#allocation6 + $0x30] sm:$0xff]  }
 0x30b   :  { %1308 = vmatprep.subr.bf16.mxu1 %v1624_v54 }
 0x30e   :  { %1309 = vmatpush3.bf16.msra.mxu1 %v1486_v27 }
 0x30f   :  { %1310 = vmatprep.subr.bf16.mxu1 %v1624_v54 }
 0x312   :  { %1311 = vmatpush3.bf16.msra.mxu1 %v1487_v30 }
 0x313   :  { %1312 = vmatprep.subr.bf16.mxu1 %v1624_v54 }
 0x316   :  { %1313 = vmatpush3.bf16.msra.mxu1 %v1488_v35 }
 0x317   :  { %1338 = vmatprep.subr.bf16.mxu1 %v1624_v54 }
 0x3b9   :  { %v1265_v36 = vpop.f32.mrf.mxu1 }
 0x3bb   :  { %v1266_v38 = vpop.f32.mrf.mxu1 }
 0x3bc   :  { %v1267_v41 = vadd.f32 %v1266_v38, %v1265_v36 }
 0x3bd   :  { %v1268_v39 = vpop.f32.mrf.mxu1 }
 0x3be   :  { %v841_v44 = vadd.f32 %v1267_v41, %v709_v40 }
 0x3bf   :  { %v1269_v42 = vpop.f32.mrf.mxu1 }
 0x3c0   :  { %v1270_v43 = vadd.f32 %v1269_v42, %v1268_v39 }
 0x3c2   :  { %v844_v45 = vadd.f32 %v1270_v43, %v709_v40 }
 0x3c4   :  { %v863_v46 = vpack.c.bf16 %v844_v45, %v841_v44 }
 0x3c6   :  { %1315 = vmatmul.mubr.bf16.vlgmr.msra.gmra.mxu1 %v863_v46 }
 0x3c7   :  { %1354 = vmatprep.mubr.msk.bf16.mxu1 %vm1625_vm0, %v1624_v54  ;;  %1339 = vmatpush3.bf16.msra.mxu1 %v1489_v57 }
 0x3c8   :  { %1340 = vmatprep.subr.bf16.mxu1 %v1624_v54 }
 0x3cb   :  { %1341 = vmatpush3.bf16.msra.mxu1 %v1490_v58 }
 0x3cc   :  { %1342 = vmatprep.subr.bf16.mxu1 %v1624_v54 }
 0x3cf   :  { %1343 = vmatpush3.bf16.msra.mxu1 %v1491_v59 }
 0x3d0   :  { %1344 = vmatprep.subr.bf16.mxu1 %v1624_v54 }
 0x3d3   :  { %1345 = vmatpush3.bf16.msra.mxu1 %v1492_v60 }
 0x3d4   :  { %1346 = vmatprep.subr.bf16.mxu1 %v1624_v54 }
 0x3d7   :  { %1347 = vmatpush3.bf16.msra.mxu1 %v1493_v61 }
 0x3d8   :  { %1348 = vmatprep.subr.bf16.mxu1 %v1624_v54 }
 0x3db   :  { %1349 = vmatpush3.bf16.msra.mxu1 %v1494_v62 }
 0x3dc   :  { %1350 = vmatprep.subr.bf16.mxu1 %v1624_v54 }
 0x3df   :  { %1351 = vmatpush3.bf16.msra.mxu1 %v1495_v63 }
 0x3e0   :  { %1352 = vmatprep.subr.bf16.mxu1 %v1624_v54  ;;  %v1012_v54 = vrot.slane %v1765_v11, %v1011_v12 }
 0x3e3   :  { %1353 = vmatpush3.bf16.msra.mxu1 %v1496_v0 }
 0x486   :  { %v946_v47 = vpop.f32.mrf.mxu1 }
 0x487   :  { %v953_v49 = vsub.f32 %v841_v44, %v946_v47 }
 0x488   :  { %v1316_v48 = vpop.f32.mrf.mxu1 }
 0x489   :  { %v955_v53 = vmul.f32 %v953_v49, %v953_v49 }
 0x48a   :  { %v949_v50 = vpop.f32.mrf.mxu1 }
 0x48b   :  { %v954_v51 = vsub.f32 %v844_v45, %v949_v50 }
 0x48c   :  { %v1317_v52 = vpop.f32.mrf.mxu1 }
 0x48d   :  { %v956_v55 = vmul.f32 %v954_v51, %v954_v51 }
 0x48f   :  { %v957_v56 = vpack.c.bf16 %v956_v55, %v955_v53 }
 0x491   :  { %1335 = vmatmul.mubr.bf16.vlgmr.msra.gmra.mxu0 %v957_v56 }
 0x551   :  { %v992_v1 = vpop.f32.mrf.mxu0 }
 0x552   :  { %v993_v2 = vadd.f32 1e-05, %v992_v1 }
 0x553   :  { %v1336_v3 = vpop.f32.mrf.mxu0 }
 0x554   :  { %1505 = vrsqrt.f32 %v993_v2 }
 0x555   :  { %v995_v4 = vpop.f32.mrf.mxu0 }
 0x556   :  { %v996_v5 = vadd.f32 1e-05, %v995_v4 }
 0x557   :  { %v1337_v6 = vpop.f32.mrf.mxu0 }
 0x558   :  { %1507 = vrsqrt.f32 %v996_v5 }
 0x561   :  { %v1506_v13 = vpop.eup %1505 }
 0x562   :  { %v1001_v14 = vmul.f32 %v1506_v13, %v953_v49 }
 0x564   :  { %v1007_v15 = vmul.f32 %v1006_v9, %v1001_v14 }
 0x565   :  { %v1508_v16 = vpop.eup %1507 }
 0x566   :  { %v1002_v17 = vmul.f32 %v1508_v16, %v954_v51  ;;  %v1013_v19 = vadd.f32 %v1012_v54, %v1007_v15 }
 0x568   :  { %v1008_v18 = vmul.f32 %v1006_v9, %v1002_v17  ;;  %v1015_v21 = vmax.f32 %v1013_v19, 0.0 }
 0x56a   :  { %v1014_v20 = vadd.f32 %v1012_v54, %v1008_v18 }
 0x56c   :  { %v1016_v22 = vmax.f32 %v1014_v20, 0.0 }
 0x56e   :  { %v1017_v23 = vpack.c.bf16 %v1016_v22, %v1015_v21 }
 0x570   :  { %1355 = vmatmul.mubr.bf16.vlgmr.msra.gmra.mxu1 %v1017_v23 }
 0x630   :  { %v1120_v25 = vpop.f32.mrf.mxu1 }
 0x631   :  { %v1121_v26 = vadd.f32 %v1120_v25, %v1037_v29 }
 0x632   :  { %v1356_v28 = vpop.f32.mrf.mxu1 }
 0x634   :  { %v1123_v31 = vpop.f32.mrf.mxu1 }
 0x635   :  { %v1124_v32 = vadd.f32 %v1123_v31, %v1037_v29 }
 0x636   :  { %v1357_v33 = vpop.f32.mrf.mxu1 }
 0x637   :  { %v1247_v10 = vpack.c.bf16 %v1124_v32, %v1121_v26 }
 0x639   :  { %1248 = vst [vmem:[%s1840_s7] sm:$0xff] %v1247_v10  }
 0x63a   :  { %1141 = vsyncpa [#allocation3], 1 }
 0x63b   :  { %1142 = vsyncpa [#allocation5], 1 }
 0x63c   :  { %1143 = vsyncpa [#allocation8], 1 }

</bundles_post_ra>
